<compile_context>
chip_gen: v6e
topology: v6e:2x2x1
jax: 0.10.0
libtpu: 0.0.40
codegen_flags: <defaults>
</compile_context>

<pallas_src>
import functools

import jax
import jax.numpy as jnp
import numpy as np
from jax.experimental import pallas as pl
from jax.experimental.pallas import tpu as pltpu


def _repconv_kernel(mask_ref, w_ref, x_ref, o_ref, xpad_ref, *, W):
    """mask_ref: (2, HW) f32  -- row0: output col >= 1 valid (dw=-1), row1: col <= W-2 (dw=+1)
    w_ref:    (c2_tile, 9*c1) bf16 fused weights, column index = (kh*3 + kw)*c1 + cin
    x_ref:    (c1, HW) bf16   one batch element, spatial flattened lane-dense
    o_ref:    (c2_tile, HW) f32
    xpad_ref: (c1, HW + 2*(W+1)) f32 VMEM scratch (halo-padded flat image)."""
    c1, hw = x_ref.shape
    pad = W + 1

    # Halo-padded, row-flattened copy of the input: [pad zeros | x | pad zeros].
    zeros_halo = jnp.zeros((c1, pad), jnp.float32)
    xpad_ref[:, 0:pad] = zeros_halo
    xpad_ref[:, pad + hw:pad + hw + pad] = zeros_halo
    xpad_ref[:, pad:pad + hw] = x_ref[...].astype(jnp.float32)

    # Column-boundary masks: loaded and broadcast once (hoisted out of the tap loop).
    left_ok = jnp.broadcast_to(mask_ref[0:1, :], (c1, hw))     # valid where output col >= 1
    right_ok = jnp.broadcast_to(mask_ref[1:2, :], (c1, hw))    # valid where output col <= W-2

    # Build the stacked (9*c1, HW) operand: one static slice of the halo buffer per tap.
    # Row-boundary (dh = +/-1) zeroing is handled by the zero halo; only column wrap needs masks.
    parts = []
    for dh in (-1, 0, 1):
        for dw in (-1, 0, 1):
            start = pad + dh * W + dw                          # static lane offset
            sl = xpad_ref[:, start:start + hw]
            if dw == -1:
                sl = sl * left_ok
            elif dw == 1:
                sl = sl * right_ok
            parts.append(sl)
    stacked = jnp.concatenate(parts, axis=0).astype(jnp.bfloat16)   # (9*c1, HW)

    # Single MXU matmul over the full contraction K = 9*c1, f32 accumulation.
    acc = jnp.dot(w_ref[...], stacked, preferred_element_type=jnp.float32)

    # SiLU activation (EUP sigmoid), lane-dense full-width store.
    o_ref[...] = (acc * jax.nn.sigmoid(acc)).astype(o_ref.dtype)


# Quaternion mixing matrix (rows = output component r,i,j,k; cols apply to conv_r,i,j,k),
# faithfully reproducing the in-place .sub_/.add_ aliasing of the reference forward.
_QMIX = np.array(
    [[1.0, -1.0, -1.0, -1.0],   # out_r = r - i - j - k
     [1.0,  0.0,  0.0, -2.0],   # out_i = r - 2k
     [1.0, -2.0,  0.0,  0.0],   # out_j = r - 2i
     [1.0,  0.0, -2.0,  0.0]],  # out_k = r - 2j
    dtype=np.float32)


def _quaternion_big_weight(w_r, w_i, w_j, w_k):
    """Fold 4 per-component conv weights + quaternion mixing into one (c2, c1, kh, kw) weight.

    Output channel index = o*4 + p, input channel index = c*4 + q, matching the reshapes
    (B, Cq, 4, H, W) -> (B, Cq*4, H, W) and (B, Oq*4, H, W) -> (B, Oq, 4, H, W)."""
    wq = jnp.stack([w_r, w_i, w_j, w_k], axis=0)                     # (4=q, Oq, Cq, kh, kw)
    big = jnp.einsum("pq,qockl->opcqkl", jnp.asarray(_QMIX), wq)     # (Oq, 4, Cq, 4, kh, kw)
    oq, _, cq, _, kh, kw = big.shape
    return big.reshape(oq * 4, cq * 4, kh, kw)


def repconv_forward(x, w3, w1):
    """x:  (B, Cq, 4, H, W) float32   (non-first-layer quaternion layout of QConv2D)
    w3: 4 arrays (Oq, Cq, 3, 3)  -- conv1 branch (conv_r, conv_i, conv_j, conv_k), no bias
    w1: 4 arrays (Oq, Cq, 1, 1)  -- conv2 branch (conv_r, conv_i, conv_j, conv_k), no bias."""
    B, Cq, Q, H, W = x.shape
    assert Q == 4
    c1 = Cq * 4
    hw = H * W

    # Host-side constant folding: quaternion mixing + RepConv branch fusion into one 3x3 weight,
    # then flattened to a dense (c2, 9*c1) layout matching the stacked-taps operand.
    w_big3 = _quaternion_big_weight(*w3)                             # (c2, c1, 3, 3)
    w_big1 = _quaternion_big_weight(*w1)                             # (c2, c1, 1, 1)
    c2 = w_big3.shape[0]
    w_eff = w_big3.at[:, :, 1, 1].add(w_big1[:, :, 0, 0])            # 1x1 fused into centre tap
    w2d = jnp.transpose(w_eff, (0, 2, 3, 1)).reshape(c2, 9 * c1).astype(jnp.bfloat16)

    # Column boundary masks precomputed host-side (no iota / div / mod inside the kernel).
    col = np.tile(np.arange(W, dtype=np.int64), H)                   # (hw,)
    masks = jnp.asarray(np.stack([(col >= 1), (col <= W - 2)]).astype(np.float32))  # (2, hw)

    # bf16 input in HBM (halves input DMA bytes); spatial axis flattened lane-dense.
    x_flat = x.reshape(B, c1, hw).astype(jnp.bfloat16)

    # Output-channel tiling: second "parallel" grid axis (keeps both v7x TCs busy when B is 1).
    tc2 = 128 if (c2 > 128 and c2 % 128 == 0) else c2
    n_c2_tiles = c2 // tc2

    cost = pl.CostEstimate(
        flops=2 * B * c2 * 9 * c1 * hw,
        transcendentals=B * c2 * hw,
        bytes_accessed=int(x_flat.size) * 2 + B * c2 * hw * 4 + int(w2d.size) * 2 + int(masks.size) * 4,
    )

    out = pl.pallas_call(
        functools.partial(_repconv_kernel, W=W),
        out_shape=jax.ShapeDtypeStruct((B, c2, hw), jnp.float32),
        grid_spec=pltpu.PrefetchScalarGridSpec(
            num_scalar_prefetch=0,
            grid=(B, n_c2_tiles),
            in_specs=[
                pl.BlockSpec((2, hw), lambda b, j: (0, 0)),            # boundary masks (constant)
                pl.BlockSpec((tc2, 9 * c1), lambda b, j: (j, 0)),      # fused dense weights
                pl.BlockSpec((None, c1, hw), lambda b, j: (b, 0, 0)),  # one batch element
            ],
            out_specs=pl.BlockSpec((None, tc2, hw), lambda b, j: (b, j, 0)),
            scratch_shapes=[pltpu.VMEM((c1, hw + 2 * (W + 1)), jnp.float32)],
        ),
        compiler_params=pltpu.CompilerParams(
            dimension_semantics=("parallel", "parallel"),
        ),
        cost_estimate=cost,
    )(masks, w2d, x_flat)

    return out.reshape(B, c2 // 4, 4, H, W)


# ----------------------------- pure-JAX reference -----------------------------

def _conv2d_nchw(x, w, pad):
    return jax.lax.conv_general_dilated(
        x, w, window_strides=(1, 1), padding=((pad, pad), (pad, pad)),
        dimension_numbers=("NCHW", "OIHW", "NCHW"),
        precision=jax.lax.Precision.HIGHEST)


def _qconv_ref(x, weights, pad):
    """QConv2D forward (non-first-layer path), including the in-place aliasing semantics."""
    w_r, w_i, w_j, w_k = weights
    r = _conv2d_nchw(x[:, :, 0], w_r, pad)
    i = _conv2d_nchw(x[:, :, 1], w_i, pad)
    j = _conv2d_nchw(x[:, :, 2], w_j, pad)
    k = _conv2d_nchw(x[:, :, 3], w_k, pad)
    out_r = r - i - j - k
    out_i = r - 2.0 * k
    out_j = r - 2.0 * i
    out_k = r - 2.0 * j
    return jnp.stack([out_r, out_i, out_j, out_k], axis=2)           # (B, Oq, 4, H, W)


def _reference(x, w3, w1):
    # RepConv(bn=False): SiLU(conv1(x) + conv2(x)); IQBN treated as identity.
    y = _qconv_ref(x, w3, pad=1) + _qconv_ref(x, w1, pad=0)
    return y * jax.nn.sigmoid(y)


if __name__ == "__main__":
    key = jax.random.PRNGKey(0)
    c1, c2 = 8, 8                       # channel counts (must be multiples of 4)
    Cq, Oq = c1 // 4, c2 // 4
    B, H, W = 2, 16, 16

    keys = jax.random.split(key, 9)
    x = jax.random.normal(keys[0], (B, Cq, 4, H, W), dtype=jnp.float32)
    w3 = tuple(0.1 * jax.random.normal(keys[1 + t], (Oq, Cq, 3, 3), dtype=jnp.float32)
               for t in range(4))
    w1 = tuple(0.1 * jax.random.normal(keys[5 + t], (Oq, Cq, 1, 1), dtype=jnp.float32)
               for t in range(4))

    out = jax.block_until_ready(repconv_forward(x, w3, w1))
    ref = jax.block_until_ready(_reference(x, w3, w1))
    # bf16 matmul operands (f32 accumulation) vs f32 reference -> loosened tolerance.
    np.testing.assert_allclose(np.asarray(out), np.asarray(ref), rtol=3e-2, atol=3e-2)

    print("KERNEL_OK")
</pallas_src>

<mosaic_0001>
module attributes {stable_mosaic.version = 11 : i64} {
  func.func @_repconv_kernel(%arg0: i32, %arg1: i32, %arg2: memref<2x256xf32, #tpu.memory_space<vmem>>, %arg3: memref<8x72xbf16, #tpu.memory_space<vmem>>, %arg4: memref<1x8x256xbf16, #tpu.memory_space<vmem>>, %arg5: memref<1x8x256xf32, #tpu.memory_space<vmem>>, %arg6: memref<8x290xf32, #tpu.memory_space<vmem>>) attributes {dimension_semantics = [#tpu.dimension_semantics<parallel>, #tpu.dimension_semantics<parallel>], iteration_bounds = array<i64: 2, 1>, scalar_prefetch = 0 : i64, scratch_operands = 1 : i64, tpu.core_type = #tpu.core_type<tc>, window_params = [{pipeline_mode = #tpu.pipeline_mode<synchronous>, transform_indices = @transform_0, window_bounds = array<i64: 2, 256>}, {transform_indices = @transform_1, window_bounds = array<i64: 8, 72>}, {transform_indices = @transform_2, window_bounds = array<i64: 1, 8, 256>}, {transform_indices = @transform_3, window_bounds = array<i64: 1, 8, 256>}]} {
    %cst = arith.constant 0.000000e+00 : f32
    %0 = vector.broadcast %cst : f32 to vector<8x17xf32>
    %c0 = arith.constant 0 : index
    %c0_0 = arith.constant 0 : index
    %1 = vector.load %arg6[%c0, %c0_0] : memref<8x290xf32, #tpu.memory_space<vmem>>, vector<8x17xf32>
    tpu.vector_store %arg6[%c0, %c0_0], %0 {strides = array<i32>} : memref<8x290xf32, #tpu.memory_space<vmem>>, vector<8x17xf32>,
    %c0_1 = arith.constant 0 : index
    %c273 = arith.constant 273 : index
    %2 = vector.load %arg6[%c0_1, %c273] : memref<8x290xf32, #tpu.memory_space<vmem>>, vector<8x17xf32>
    tpu.vector_store %arg6[%c0_1, %c273], %0 {strides = array<i32>} : memref<8x290xf32, #tpu.memory_space<vmem>>, vector<8x17xf32>,
    %c0_2 = arith.constant 0 : index
    %c0_3 = arith.constant 0 : index
    %c0_4 = arith.constant 0 : index
    %3 = vector.load %arg4[%c0_2, %c0_3, %c0_4] : memref<1x8x256xbf16, #tpu.memory_space<vmem>>, vector<1x8x256xbf16>
    %4 = vector.shape_cast %3 : vector<1x8x256xbf16> to vector<8x256xbf16>
    %5 = arith.extf %4 : vector<8x256xbf16> to vector<8x256xf32>
    %c0_5 = arith.constant 0 : index
    %c17 = arith.constant 17 : index
    %6 = vector.load %arg6[%c0_5, %c17] : memref<8x290xf32, #tpu.memory_space<vmem>>, vector<8x256xf32>
    tpu.vector_store %arg6[%c0_5, %c17], %5 {strides = array<i32>} : memref<8x290xf32, #tpu.memory_space<vmem>>, vector<8x256xf32>,
    %c0_6 = arith.constant 0 : index
    %c0_7 = arith.constant 0 : index
    %7 = vector.load %arg2[%c0_6, %c0_7] : memref<2x256xf32, #tpu.memory_space<vmem>>, vector<1x256xf32>
    %8 = vector.shape_cast %7 : vector<1x256xf32> to vector<1x256xf32>
    %9 = vector.broadcast %8 : vector<1x256xf32> to vector<8x256xf32>
    %c1 = arith.constant 1 : index
    %c0_8 = arith.constant 0 : index
    %10 = vector.load %arg2[%c1, %c0_8] : memref<2x256xf32, #tpu.memory_space<vmem>>, vector<1x256xf32>
    %11 = vector.shape_cast %10 : vector<1x256xf32> to vector<1x256xf32>
    %12 = vector.broadcast %11 : vector<1x256xf32> to vector<8x256xf32>
    %c0_9 = arith.constant 0 : index
    %c0_10 = arith.constant 0 : index
    %13 = vector.load %arg6[%c0_9, %c0_10] : memref<8x290xf32, #tpu.memory_space<vmem>>, vector<8x256xf32>
    %14 = arith.mulf %13, %9 : vector<8x256xf32>
    %c0_11 = arith.constant 0 : index
    %c1_12 = arith.constant 1 : index
    %15 = vector.load %arg6[%c0_11, %c1_12] : memref<8x290xf32, #tpu.memory_space<vmem>>, vector<8x256xf32>
    %c0_13 = arith.constant 0 : index
    %c2 = arith.constant 2 : index
    %16 = vector.load %arg6[%c0_13, %c2] : memref<8x290xf32, #tpu.memory_space<vmem>>, vector<8x256xf32>
    %17 = arith.mulf %16, %12 : vector<8x256xf32>
    %c0_14 = arith.constant 0 : index
    %c16 = arith.constant 16 : index
    %18 = vector.load %arg6[%c0_14, %c16] : memref<8x290xf32, #tpu.memory_space<vmem>>, vector<8x256xf32>
    %19 = arith.mulf %18, %9 : vector<8x256xf32>
    %c0_15 = arith.constant 0 : index
    %c17_16 = arith.constant 17 : index
    %20 = vector.load %arg6[%c0_15, %c17_16] : memref<8x290xf32, #tpu.memory_space<vmem>>, vector<8x256xf32>
    %c0_17 = arith.constant 0 : index
    %c18 = arith.constant 18 : index
    %21 = vector.load %arg6[%c0_17, %c18] : memref<8x290xf32, #tpu.memory_space<vmem>>, vector<8x256xf32>
    %22 = arith.mulf %21, %12 : vector<8x256xf32>
    %c0_18 = arith.constant 0 : index
    %c32 = arith.constant 32 : index
    %23 = vector.load %arg6[%c0_18, %c32] : memref<8x290xf32, #tpu.memory_space<vmem>>, vector<8x256xf32>
    %24 = arith.mulf %23, %9 : vector<8x256xf32>
    %c0_19 = arith.constant 0 : index
    %c33 = arith.constant 33 : index
    %25 = vector.load %arg6[%c0_19, %c33] : memref<8x290xf32, #tpu.memory_space<vmem>>, vector<8x256xf32>
    %c0_20 = arith.constant 0 : index
    %c34 = arith.constant 34 : index
    %26 = vector.load %arg6[%c0_20, %c34] : memref<8x290xf32, #tpu.memory_space<vmem>>, vector<8x256xf32>
    %27 = arith.mulf %26, %12 : vector<8x256xf32>
    %28 = tpu.concatenate %14, %15, %17, %19, %20, %22, %24, %25, %27 in 0 : vector<8x256xf32>, vector<8x256xf32>, vector<8x256xf32>, vector<8x256xf32>, vector<8x256xf32>, vector<8x256xf32>, vector<8x256xf32>, vector<8x256xf32>, vector<8x256xf32> -> vector<72x256xf32>
    %29 = arith.truncf %28 : vector<72x256xf32> to vector<72x256xbf16>
    %c0_21 = arith.constant 0 : index
    %c0_22 = arith.constant 0 : index
    %30 = vector.load %arg3[%c0_21, %c0_22] : memref<8x72xbf16, #tpu.memory_space<vmem>>, vector<8x72xbf16>
    %cst_23 = arith.constant dense<0.000000e+00> : vector<8x256xf32>
    %31 = tpu.matmul %30, %29, %cst_23 {dimension_numbers = #tpu.dot_dimension_numbers<[1], [0], [0], [1], [0, 0, 1, 1], [], []>} : vector<8x72xbf16>, vector<72x256xbf16>, vector<8x256xf32> -> vector<8x256xf32>
    %32 = arith.negf %31 : vector<8x256xf32>
    %33 = math.exp %32 : vector<8x256xf32>
    %cst_24 = arith.constant 1.000000e+00 : f32
    %34 = vector.broadcast %cst_24 : f32 to vector<8x256xf32>
    %35 = arith.addf %34, %33 : vector<8x256xf32>
    %36 = arith.divf %34, %35 : vector<8x256xf32>
    %37 = arith.mulf %31, %36 : vector<8x256xf32>
    %c0_25 = arith.constant 0 : index
    %c0_26 = arith.constant 0 : index
    %c0_27 = arith.constant 0 : index
    %38 = vector.load %arg5[%c0_25, %c0_26, %c0_27] : memref<1x8x256xf32, #tpu.memory_space<vmem>>, vector<1x8x256xf32>
    %39 = vector.shape_cast %38 : vector<1x8x256xf32> to vector<8x256xf32>
    %40 = vector.shape_cast %37 : vector<8x256xf32> to vector<1x8x256xf32>
    tpu.vector_store %arg5[%c0_25, %c0_26, %c0_27], %40 {strides = array<i32>} : memref<1x8x256xf32, #tpu.memory_space<vmem>>, vector<1x8x256xf32>,
    return
  }
  func.func @transform_0(%arg0: i32, %arg1: i32) -> (i32, i32) {
    %c0_i32 = arith.constant 0 : i32
    %c0_i32_0 = arith.constant 0 : i32
    %c0_i32_1 = arith.constant 0 : i32
    return %c0_i32, %c0_i32_0 : i32, i32
  }
  func.func @transform_1(%arg0: i32, %arg1: i32) -> (i32, i32) {
    %c0_i32 = arith.constant 0 : i32
    %c0_i32_0 = arith.constant 0 : i32
    return %arg1, %c0_i32 : i32, i32
  }
  func.func @transform_2(%arg0: i32, %arg1: i32) -> (i32, i32, i32) {
    %c0_i32 = arith.constant 0 : i32
    %c0_i32_0 = arith.constant 0 : i32
    %c0_i32_1 = arith.constant 0 : i32
    return %arg0, %c0_i32, %c0_i32_0 : i32, i32, i32
  }
  func.func @transform_3(%arg0: i32, %arg1: i32) -> (i32, i32, i32) {
    %c0_i32 = arith.constant 0 : i32
    %c0_i32_0 = arith.constant 0 : i32
    return %arg0, %arg1, %c0_i32 : i32, i32, i32
  }
}

</mosaic_0001>

<bundles_post_ra>
// kernel: tpu_custom_call.1
= control target key start
LH: loop header
LB: loop body
LE: loop exit
PB: predicated region body
PF: predicated region fallthrough
CT: control target
= control target key end

     0   :  { %8 = vsyncpa [#allocation4], 0  ;;  %s1247_s0 = inlined_call_operand.hbm [shape: f32[2,256], index: 0, kind: input, shape index: {}]   ;;  %s1248_s1 = inlined_call_operand.hbm [shape: bf16[8,72], index: 1, kind: input, shape index: {}]   ;;  %s1249_s2 = inlined_call_operand.hbm [shape: bf16[2,8,256], index: 2, kind: input, shape index: {}]   ;;  %s1250_s3 = inlined_call_operand.hbm [shape: f32[2,8,256], index: 3, kind: output, shape index: {}]  }
   0x1   :  { %9 = vsyncpa [#allocation7], 0 }
   0x2   :  { %10 = vsyncpa [#allocation5], 0 }
   0x3   :  { %12 = vsyncpa [#allocation5 + $0x1], 0  ;;  %s1032_s12 = smov 0   ;;  %s1034_s13 = smov 0  }
   0x4   :  { %s1036_s14 = smov 0   ;;  %s1038_s15 = smov 0  }
   0x5   :  { %s1040_s16 = smov 0   ;;  %s1042_s17 = smov 0  }
   0x6 LB: > { %s1063_s18 = sadd.s32 4294967295, %s990_s17   ;;  %s646_s19 = sadd.s32 4294967294, %s990_s17   ;;  %s990_s17 = sphi %s1042_s17, %s18_s17   ;;  %s986_s16 = sphi %s1040_s16, %s1273_s16   ;;  %s982_s15 = sphi %s1038_s15, %s1272_s15   ;;  %s978_s14 = sphi %s1036_s14, %s1271_s14   ;;  %s974_s13 = sphi %s1034_s13, %s1270_s13   ;;  %s970_s12 = sphi %s1032_s12, %s1269_s12  }
   0x7   : > { %p97_p0 = scmp.ne.s32.totalorder %s974_s13, %s970_s12  ;;  %p1251_p1 = scmp.eq.s32.totalorder %s1063_s18, 0 }
   0x8   : > { %p129_p3 = scmp.eq.s32.totalorder %s646_s19, 1  ;;  %p647_p5 = scmp.ge.s32.totalorder %s990_s17, 1 }
   0x9   : > { %p1072_p4 = por %p1251_p1, %p97_p0  ;;  %p136_p7 = scmp.lt.s32.totalorder %s990_s17, 3 }
   0xa   : > { %p1077_p6 = por %p129_p3, %p97_p0  ;;  %s992_s23 = smov [#allocation3]  }
   0xb   : > { %s1254_s20 = scalar_select %p1072_p4, 1, 0 }
   0xc   : > { %s1255_s21 = scalar_select %p1077_p6, 1, 0 }
   0xd   : > { %p1082_p8 = pnand %p647_p5, %p136_p7  ;;  %s149_s24 = sshll.u32 %s992_s23, 4  ;;  %s150_s24 = int_to_ptr.vmem [resolvable:$true] %s149_s24 }
   0xe   : > { %s993_s25 = smov [#allocation6]   ;;  %s833_s28 = scalar_lea.vmem %s150_s24, 64 }
   0xf   : > { %s1256_s22 = scalar_select %p1082_p8, 1, 0 }
  0x10   : > { %p682_p10 = pneg %p1082_p8  ;;  %s162_s26 = sshll.u32 %s993_s25, 4  ;;  %s163_s26 = int_to_ptr.vmem [resolvable:$true] %s162_s26 }
  0x11   : > { %p834_p13 = scmp.ne.s32.totalorder %s150_s24, %s833_s28  ;;  %p841_p5 = scmp.lt.s32.totalorder %s150_s24, %s150_s24 }
  0x12   : > { %p1091_p11 = pnand %p682_p10, %p1251_p1  ;;  %p842_p7 = scmp.lt.s32.totalorder %s833_s28, %s833_s28 }
  0x14   : > { %p824_p12 = pneg %p1091_p11  ;;  %p843_p9 = por %p842_p7, %p841_p5 }
  0x16   : > { %p836_p0 = pnand %p834_p13, %p824_p12 }
  0x18   : > { %p837_p3 = pneg %p836_p0 }
  0x1a   : > { %p844_p2 = pnand %p843_p9, %p837_p3 }
  0x1c   : > { %847 = shalt.err (!%p844_p2)
}
  0x1d   : > { %685 = dma.hbm_to_vmem [thread:$0]  (!%p1091_p11), %s1247_s0, 64, %s150_s24, [#allocation4]  }
  0x1e   : > { %s859_s4 = scalar_lea.vmem %s163_s26, 64  ;;  %p867_p13 = scmp.lt.s32.totalorder %s163_s26, %s163_s26 }
  0x1f   : > { %p860_p10 = scmp.ne.s32.totalorder %s163_s26, %s859_s4  ;;  %p868_p0 = scmp.lt.s32.totalorder %s859_s4, %s859_s4 }
  0x21   : > { %p862_p1 = pnand %p860_p10, %p824_p12  ;;  %p869_p4 = por %p868_p0, %p867_p13 }
  0x23   : > { %p863_p6 = pneg %p862_p1 }
  0x25   : > { %p870_p8 = pnand %p869_p4, %p863_p6 }
  0x27   : > { %873 = shalt.err (!%p870_p8)
}
  0x28   : > { %688 = dma.hbm_to_vmem [thread:$0]  (!%p1091_p11), %s1248_s1, 64, %s163_s26, [#allocation7]  }
  0x29   : > { %s30_s7 = sadd.s32 1, %s986_s16  ;;  %s84_s8 = sadd.s32 1, %s978_s14 }
  0x2a   : > { %p32_p1 = scmp.ge.s32.totalorder %s30_s7, 2  ;;  %p91_p2 = scmp.ne.s32.totalorder %s978_s14, %s974_s13 }
  0x2b   : > { %p92_p4 = scmp.eq.s32.totalorder %s990_s17, 0  ;;  %p699_p6 = scmp.lt.s32.totalorder %s990_s17, 2 }
  0x2c   : > { %s1275_s7 = smov (%p32_p1, %s30_s7), 0  ;;  %p1258_p9 = scmp.eq.s32.totalorder %s1063_s18, 1 }
  0x2d   : > { %p93_p8 = por %p92_p4, %p91_p2  ;;  %s81_s10 = ssub.s32 %s986_s16, %s1275_s7 }
  0x2e   : > { %p1123_p12 = por %p1258_p9, %p91_p2  ;;  %s173_s11 = sand.u32 1, %s990_s17  }
  0x2f   : > { %p82_p3 = scmp.eq.s32.totalorder %s81_s10, 0  ;;  %s175_s19 = sand.u32 1, %s978_s14  }
  0x30   : > { %s668_s23 = sshll.u32 %s986_s16, 7  ;;  %s651_s25 = sshll.u32 %s175_s19, 3 }
  0x31   : > { %s1133_s24 = scalar_select %p82_p3, %s978_s14, %s84_s8  }
  0x32   : > { %s183_s28 = scalar_lea.hbm %s1249_s2, %s668_s23  ;;  %p1138_p11 = pnand %p699_p6, %p93_p8 }
  0x33   : > { %s177_s30 = scalar_lea.vmem [#allocation8], %s651_s25  ;;  %s174_s5 = scalar_lea.sflag [#allocation4], %s173_s11 }
  0x34   : > { %s185_s4 = sshll.u32 %s177_s30, 4  ;;  %p876_p5 = pneg %p1138_p11  ;;  %s186_s4 = int_to_ptr.vmem [resolvable:$true] %s185_s4 }
  0x35   : > { %s887_s6 = scalar_lea.vmem %s186_s4, 128  ;;  %s994_s8 = smov [#allocation8]  }
  0x36   : > { %p888_p7 = scmp.ne.s32.totalorder %s186_s4, %s887_s6  ;;  %s892_s10 = sshll.u32 %s994_s8, 4  ;;  %s893_s10 = int_to_ptr.vmem [resolvable:$false] %s892_s10 }
  0x37   : > { %s894_s19 = scalar_lea.vmem %s893_s10, 256  ;;  %p895_p0 = scmp.lt.s32.totalorder %s186_s4, %s893_s10 }
  0x38   : > { %p890_p10 = pnand %p888_p7, %p876_p5  ;;  %p896_p1 = scmp.lt.s32.totalorder %s894_s19, %s887_s6 }
  0x3a   : > { %p891_p13 = pneg %p890_p10  ;;  %p897_p2 = por %p896_p1, %p895_p0 }
  0x3c   : > { %p898_p4 = pnand %p897_p2, %p891_p13 }
  0x3e   : > { %901 = shalt.err (!%p898_p4)
}
  0x3f   : > { %692 = dma.hbm_to_vmem [thread:$0]  (!%p1138_p11), %s183_s28, 128, %s186_s4, %s174_s5  }
  0x40   : > { %p1261_p6 = scmp.ne.s32.totalorder %s1256_s22, 0 }
  0x41   : > { %p1262_p8 = scmp.eq.s32.totalorder (!%p1261_p6), %s1063_s18, 0 }
  0x42   : > { %194 = sbr.rel (%p1261_p6) target bundleno = 604 (0x25c), region = 32 }
  0x47   : > { %953 = dma.done.wait (%p1262_p8), [#allocation4], 64   ;;  %p1263_p9 = pmov %p1262_p8 }
  0x48   : > { %p1264_p3 = pmov %p1262_p8 }
  0x49   : > { %955 = vsyncadd (%p1263_p9), [#allocation4], 4294967232 }
  0x4a   : > { %957 = dma.done.wait (%p1264_p3), [#allocation7], 64   ;;  %p1265_p5 = pmov %p1264_p3 }
  0x4b   : > { %s204_s11 = sand.u32 1, %s1063_s18   ;;  %s1158_s23 = sand.u32 1, %s974_s13  }
  0x4c   : > { %959 = vsyncadd (%p1265_p5), [#allocation7], 4294967232  ;;  %s657_s22 = sshll.u32 %s1158_s23, 3  ;;  %s205_s25 = scalar_lea.sflag [#allocation4], %s204_s11 }
  0x4d   : > { %s208_s26 = scalar_lea.vmem [#allocation8], %s657_s22  ;;  %p1266_p11 = scmp.ne.s32.totalorder %s1254_s20, 0 }
  0x4f   : > { %961 = dma.done.wait (%p1266_p11), %s205_s25, 128  }
  0x50   : > { %963 = vsyncadd (%p1266_p11), %s205_s25, 4294967168  ;;  %v255_v0 = vlaneseq  ;;  %vm232_vm0 = vcmask 138240   ;;  %vm234_vm1 = vcmask 277640   ;;  %v995_v1 = vmov 0.0   ;;  %v236_v6 = vld [vmem:[%s208_s26] sm:$0xff]  ;;  %s996_s18 = smov 34  }
  0x51   : > { %233 = vst.msk [vmem:[#allocation2] sm:$0xff] %vm232_vm0, %v995_v1  ;;  %v266_v5 = vld [vmem:[#allocation3 + $0x1] ss:$2 sm:$0x3]  ;;  %v237_v8 = vunpack.c.l.bf16 %v236_v6  ;;  %v238_v9 = vunpack.c.h.bf16 %v236_v6  ;;  %s997_s20 = smov 17   ;;  %s998_s27 = smov 32  }
  0x52   : > { %235 = vst.msk [vmem:[#allocation2 + $0x10] sm:$0xff] %vm234_vm1, %v995_v1  ;;  %v256_v2 = vshrl.u32 %v255_v0, 7  ;;  %v253_v10 = vld [vmem:[#allocation3] ss:$2 sm:$0x3]  ;;  %s999_s28 = smov 18  }
  0x53   : > { %v769_v11 = vpack.i.bf16 %v238_v9, %v237_v8  ;;  %s1000_s29 = smov 2   ;;  %s1001_s30 = smov 16   ;;  %vm249_vm2 = vcmask 1047688   ;;  %vm333_vm3 = vcmask 277504   ;;  %vm321_vm4 = vcmask 261120  }
  0x54   : > { %v261_v3 = vsub.s32 1, %v256_v2  ;;  %v257_v4 = vsub.s32 0, %v256_v2  ;;  %s1002_s4 = smov 111   ;;  %s1003_s5 = smov 95   ;;  %vm309_vm5 = vcmask 146432   ;;  %vm297_vm6 = vcmask 130048  }
  0x55   : > { %770 = vrot.lane.b32.xlu0 %v769_v11, %s997_s20  ;;  %s1004_s6 = smov 96   ;;  %s1005_s8 = smov 94   ;;  %vm285_vm7 = vcmask 15360   ;;  %v1009_v56 = vmov 0   ;;  %vm442_vm8 = vcmask 769024   ;;  %vm462_vm9 = vcmask 1043456  }
  0x56   : > { %v275_v7 = vrot.slane %v266_v5, %v261_v3  ;;  %v1166_v12 = vrot.slane %v253_v10, %v257_v4  ;;  %v271_v13 = vrot.slane %v266_v5, %v257_v4  ;;  %v1169_v14 = vrot.slane %v253_v10, %v261_v3  ;;  %s1006_s10 = smov 110   ;;  %s1007_s19 = smov 126   ;;  %501 = vmatprep.mubr.bf16.mxu0 %v1009_v56 }
  0x57   : > { %s1008_s11 = smov 112   ;;  %s1010_s22 = smov 127   ;;  %vm428_vm10 = vcmask 777216   ;;  %vm417_vm11 = vcmask 785408   ;;  %vm403_vm12 = vcmask 900096   ;;  %vm389_vm13 = vcmask 908288  }
  0x58   : > { %331 = vrot.lane.b32.xlu1 %v275_v7, %s996_s18  ;;  %vm378_vm14 = vcmask 916480   ;;  %vm364_vm15 = vcmask 1031168   ;;  %vm458_vm1 = vcmask 588800   ;;  %s658_s25 = sshll.u32 %s1158_s23, 4  ;;  %s669_s26 = sshll.u32 %s982_s15, 8 }
  0x59   : > { %329 = vrot.lane.b32.xlu0 %v271_v13, %s996_s18  ;;  %s230_s18 = scalar_lea.vmem [#allocation9], %s658_s25 }
  0x5a   : > { %s543_s20 = sshll.u32 %s230_s18, 4  ;;  %s544_s20 = int_to_ptr.vmem [resolvable:$true] %s543_s20 }
  0x5c   : > { %317 = vrot.lane.b32.xlu1 %v1166_v12, %s998_s27 }
  0x5d   : > { %319 = vrot.lane.b32.xlu0 %v1169_v14, %s998_s27 }
  0x60   : > { %305 = vrot.lane.b32.xlu1 %v271_v13, %s999_s28 }
  0x61   : > { %307 = vrot.lane.b32.xlu0 %v275_v7, %s999_s28 }
  0x64   : > { %281 = vrot.lane.b32.xlu1 %v271_v13, %s1000_s29 }
  0x65   : > { %283 = vrot.lane.b32.xlu0 %v275_v7, %s1000_s29  ;;  %s541_s29 = scalar_lea.hbm %s1250_s3, %s669_s26 }
  0x68   : > { %293 = vrot.lane.b32.xlu1 %v1166_v12, %s1001_s30 }
  0x69   : > { %295 = vrot.lane.b32.xlu0 %v1169_v14, %s1001_s30  ;;  %s527_s30 = scalar_lea.sflag [#allocation5], %s1158_s23 }
  0xc7   : > { %v771_v16 = vpop.permute.xlu0 %770 }
  0xc8   : > { %v773_v17 = vunpack.i.h.bf16 %v771_v16  ;;  %v772_v18 = vunpack.i.l.bf16 %v771_v16 }
  0xca   : > { %v332_v15 = vpop.permute.xlu1 %331  ;;  %v1175_v19 = vsel %vm232_vm0, %v772_v18, %v773_v17  ;;  %250 = vst.msk [vmem:[#allocation2] sm:$0xff] %vm249_vm2, %v772_v18 }
  0xcb   : > { %252 = vst.msk [vmem:[#allocation2 + $0x10] sm:$0xff] %vm232_vm0, %v773_v17  ;;  %v330_v21 = vpop.permute.xlu0 %329  ;;  %vm350_vm0 = vcmask 1039360  }
  0xcc   : > { %v334_v28 = vsel %vm333_vm3, %v330_v21, %v332_v15 }
  0xcd   : > { %v339_v35 = vmul.f32 %v334_v28, %v1175_v19 }
  0xce   : > { %v318_v20 = vpop.permute.xlu1 %317 }
  0xcf   : > { %v320_v22 = vpop.permute.xlu0 %319 }
  0xd0   : > { %v322_v33 = vsel %vm321_vm4, %v318_v20, %v320_v22 }
  0xd1   : > { %v1178_v23 = vld [vmem:[#allocation2] sm:$0xff]  ;;  %v327_v39 = vmul.f32 %v322_v33, %v1175_v19 }
  0xd2   : > { %v306_v24 = vpop.permute.xlu1 %305  ;;  %v280_v25 = vld [vmem:[#allocation2 + $0x10] sm:$0xff]  ;;  %383 = vrot.lane.b32.xlu1 %v1178_v23, %s1002_s4  ;;  %422 = vrot.lane.b32.xlu0 %v1178_v23, %s1003_s5  ;;  %v326_v31 = vmul.f32 %v318_v20, %v1178_v23  ;;  %v338_v32 = vmul.f32 %v330_v21, %v1178_v23 }
  0xd3   : > { %v308_v26 = vpop.permute.xlu0 %307  ;;  %v779_v27 = vpack.i.bf16 %v280_v25, %v1175_v19  ;;  %v340_v34 = vmul.f32 %v332_v15, %v280_v25  ;;  %v328_v40 = vmul.f32 %v320_v22, %v280_v25  ;;  %v314_v41 = vmul.f32 %v306_v24, %v1178_v23 }
  0xd4   : > { %v310_v36 = vsel %vm309_vm5, %v306_v24, %v308_v26  ;;  %v784_v38 = vpack.i.bf16 %v339_v35, %v338_v32  ;;  %v316_v43 = vmul.f32 %v308_v26, %v280_v25 }
  0xd5   : > { %v315_v42 = vmul.f32 %v310_v36, %v1175_v19  ;;  %v789_v46 = vpack.i.bf16 %v328_v40, %v327_v39 }
  0xd6   : > { %780 = vrot.lane.b32.xlu1 %v779_v27, %s1002_s4  ;;  %v282_v29 = vpop.permute.xlu1 %281  ;;  %775 = vrot.lane.b32.xlu0 %v779_v27, %s1003_s5  ;;  %s902_s4 = scalar_lea.vmem %s544_s20, 256  ;;  %s1011_s5 = smov [#allocation9]  }
  0xd7   : > { %v284_v30 = vpop.permute.xlu0 %283  ;;  %v794_v47 = vpack.i.bf16 %v316_v43, %v315_v42  ;;  %v290_v51 = vmul.f32 %v282_v29, %v1178_v23  ;;  %p903_p7 = scmp.ne.s32.totalorder %s544_s20, %s902_s4  ;;  %s906_s15 = sshll.u32 %s1011_s5, 4  ;;  %s907_s15 = int_to_ptr.vmem [resolvable:$false] %s906_s15 }
  0xd8   : > { %v286_v48 = vsel %vm285_vm7, %v282_v29, %v284_v30  ;;  %v292_v53 = vmul.f32 %v284_v30, %v280_v25  ;;  %p909_p0 = scmp.lt.s32.totalorder %s544_s20, %s907_s15 }
  0xd9   : > { %v291_v52 = vmul.f32 %v286_v48, %v1175_v19  ;;  %p904_p10 = pnand %p903_p7, %p1123_p12 }
  0xda   : > { %411 = vrot.lane.b32.xlu1 %v326_v31, %s1004_s6  ;;  %440 = vrot.lane.b32.xlu0 %v340_v34, %s1005_s8  ;;  %v294_v44 = vpop.permute.xlu1 %293 }
  0xdb   : > { %v296_v37 = vpop.permute.xlu0 %295  ;;  %v799_v55 = vpack.i.bf16 %v292_v53, %v291_v52  ;;  %v302_v57 = vmul.f32 %v294_v44, %v1178_v23  ;;  %v279_v53 = vmul.f32 %v1169_v14, %v1175_v19  ;;  %p905_p13 = pneg %p904_p10 }
  0xdc   : > { %v298_v45 = vsel %vm297_vm6, %v294_v44, %v296_v37  ;;  %v304_v50 = vmul.f32 %v296_v37, %v280_v25 }
  0xdd   : > { %v303_v49 = vmul.f32 %v298_v45, %v1175_v19 }
  0xde   : > { %785 = vrot.lane.b32.xlu1 %v784_v38, %s1005_s8  ;;  %397 = vrot.lane.b32.xlu0 %v314_v41, %s1006_s10 }
  0xdf   : > { %v804_v54 = vpack.i.bf16 %v304_v50, %v303_v49 }
  0xe2   : > { %790 = vrot.lane.b32.xlu1 %v789_v46, %s1004_s6  ;;  %795 = vrot.lane.b32.xlu0 %v794_v47, %s1006_s10  ;;  %s908_s6 = scalar_lea.vmem %s907_s15, 512 }
  0xe3   : > { %p910_p1 = scmp.lt.s32.totalorder %s908_s6, %s902_s4 }
  0xe5   : > { %p911_p2 = por %p910_p1, %p909_p0 }
  0xe6   : > { %358 = vrot.lane.b32.xlu1 %v290_v51, %s1007_s19  ;;  %805 = vrot.lane.b32.xlu0 %v804_v54, %s1008_s11  ;;  %v278_v54 = vmul.f32 %v1178_v23, %v1166_v12 }
  0xe7   : > { %p912_p4 = pnand %p911_p2, %p905_p13 }
  0xea   : > { %800 = vrot.lane.b32.xlu1 %v799_v55, %s1007_s19  ;;  %372 = vrot.lane.b32.xlu0 %v302_v57, %s1008_s11 }
  0xee   : > { %810 = vrot.lane.b32.xlu1 %v779_v27, %s1010_s22  ;;  %344 = vrot.lane.b32.xlu0 %v1178_v23, %s1010_s22 }
 0x144   : > { %v384_v58 = vpop.permute.xlu1 %383  ;;  %v423_v59 = vpop.permute.xlu0 %422 }
 0x148   : > { %v781_v60 = vpop.permute.xlu1 %780  ;;  %v776_v61 = vpop.permute.xlu0 %775 }
 0x149   : > { %v778_v4 = vunpack.i.h.bf16 %v776_v61  ;;  %v777_v5 = vunpack.i.l.bf16 %v776_v61  ;;  %v783_v11 = vunpack.i.h.bf16 %v781_v60  ;;  %v782_v13 = vunpack.i.l.bf16 %v781_v60 }
 0x14b   : > { %v430_v24 = vsel %vm428_vm10, %v777_v5, %v778_v4  ;;  %v429_v26 = vsel %vm428_vm10, %v423_v59, %v777_v5  ;;  %v391_v32 = vsel %vm389_vm13, %v782_v13, %v783_v11  ;;  %v390_v38 = vsel %vm389_vm13, %v384_v58, %v782_v13  ;;  %v457_v59 = vld [vmem:[#allocation6] sm:$0xf] }
 0x14c   : > { %v412_v62 = vpop.permute.xlu1 %411  ;;  %v441_v63 = vpop.permute.xlu0 %440 }
 0x150   : > { %v786_v0 = vpop.permute.xlu1 %785  ;;  %v398_v3 = vpop.permute.xlu0 %397 }
 0x151   : > { %v788_v1 = vunpack.i.h.bf16 %v786_v0  ;;  %v787_v2 = vunpack.i.l.bf16 %v786_v0 }
 0x153   : > { %v444_v6 = vsel %vm442_vm8, %v788_v1, %v441_v63  ;;  %v443_v7 = vsel %vm442_vm8, %v787_v2, %v788_v1 }
 0x154   : > { %v791_v8 = vpop.permute.xlu1 %790  ;;  %v456_v9 = vpack.c.bf16 %v444_v6, %v444_v6  ;;  %v455_v10 = vpack.c.bf16 %v443_v7, %v443_v7  ;;  %v796_v17 = vpop.permute.xlu0 %795 }
 0x155   : > { %v793_v15 = vunpack.i.h.bf16 %v791_v8  ;;  %v792_v16 = vunpack.i.l.bf16 %v791_v8  ;;  %v798_v18 = vunpack.i.h.bf16 %v796_v17  ;;  %v797_v20 = vunpack.i.l.bf16 %v796_v17 }
 0x156   : > { %659 = vmatprep.subr.msk.bf16.mxu0 %vm462_vm9, %v456_v9  ;;  %v464_v21 = vsel %vm462_vm9, %v455_v10, 0 }
 0x157   : > { %476 = vmatpush1.bf16.msra.mxu0 %v464_v21  ;;  %v419_v22 = vsel %vm417_vm11, %v792_v16, %v793_v15  ;;  %v418_v25 = vsel %vm417_vm11, %v412_v62, %v792_v16  ;;  %v405_v30 = vsel %vm403_vm12, %v797_v20, %v798_v18  ;;  %v404_v34 = vsel %vm403_vm12, %v398_v3, %v797_v20 }
 0x158   : > { %v359_v27 = vpop.permute.xlu1 %358  ;;  %v454_v28 = vpack.c.bf16 %v430_v24, %v419_v22  ;;  %v453_v29 = vpack.c.bf16 %v429_v26, %v418_v25  ;;  %v806_v31 = vpop.permute.xlu0 %805  ;;  %v452_v33 = vpack.c.bf16 %v405_v30, %v391_v32  ;;  %v451_v42 = vpack.c.bf16 %v404_v34, %v390_v38 }
 0x159   : > { %v808_v35 = vunpack.i.h.bf16 %v806_v31  ;;  %v807_v36 = vunpack.i.l.bf16 %v806_v31 }
 0x15a   : > { %477 = vmatprep.subr.bf16.mxu0 %v454_v28 }
 0x15b   : > { %478 = vmatpush1.bf16.msra.mxu0 %v453_v29  ;;  %v380_v45 = vsel %vm378_vm14, %v807_v36, %v808_v35 }
 0x15c   : > { %479 = vmatprep.subr.bf16.mxu0 %v452_v33  ;;  %v801_v37 = vpop.permute.xlu1 %800  ;;  %v373_v39 = vpop.permute.xlu0 %372 }
 0x15d   : > { %v803_v40 = vunpack.i.h.bf16 %v801_v37  ;;  %v802_v41 = vunpack.i.l.bf16 %v801_v37  ;;  %v379_v43 = vsel %vm378_vm14, %v373_v39, %v807_v36 }
 0x15f   : > { %480 = vmatpush1.bf16.msra.mxu0 %v451_v42  ;;  %v366_v44 = vsel %vm364_vm15, %v802_v41, %v803_v40  ;;  %v365_v46 = vsel %vm364_vm15, %v359_v27, %v802_v41 }
 0x160   : > { %v811_v47 = vpop.permute.xlu1 %810  ;;  %v450_v48 = vpack.c.bf16 %v380_v45, %v366_v44  ;;  %v449_v49 = vpack.c.bf16 %v379_v43, %v365_v46  ;;  %v345_v52 = vpop.permute.xlu0 %344 }
 0x161   : > { %v813_v50 = vunpack.i.h.bf16 %v811_v47  ;;  %v812_v51 = vunpack.i.l.bf16 %v811_v47 }
 0x162   : > { %481 = vmatprep.subr.bf16.mxu0 %v450_v48 }
 0x163   : > { %482 = vmatpush1.bf16.msra.mxu0 %v449_v49  ;;  %v352_v55 = vsel %vm350_vm0, %v812_v51, %v813_v50  ;;  %v351_v56 = vsel %vm350_vm0, %v345_v52, %v812_v51 }
 0x164   : > { %v448_v57 = vpack.c.bf16 %v352_v55, %v279_v53  ;;  %v447_v58 = vpack.c.bf16 %v351_v56, %v278_v54 }
 0x166   : > { %483 = vmatprep.subr.bf16.mxu0 %v448_v57 }
 0x167   : > { %484 = vmatpush1.bf16.msra.mxu0 %v447_v58 }
 0x16a   : > { %660 = vmatmul.mubr.msk.bf16.vlgmr.msra.gmra.mxu0 %vm458_vm1, %v457_v59 }
 0x22a   : > { %v503_v60 = vpop.f32.mrf.mxu0 }
 0x22b   : > { %v661_v61 = vmul.f32 -1.442695, %v503_v60 }
 0x22c   : > { %v505_v62 = vpop.f32.mrf.mxu0 }
 0x22d   : > { %814 = vpow2.f32 %v661_v61  ;;  %v662_v14 = vmul.f32 -1.442695, %v505_v62 }
 0x22e   : > { %v507_v19 = vpop.f32.mrf.mxu0 }
 0x22f   : > { %816 = vpow2.f32 %v662_v14 }
 0x230   : > { %v508_v12 = vpop.f32.mrf.mxu0 }
 0x23a   : > { %v815_v23 = vpop.eup %814 }
 0x23b   : > { %v516_v63 = vadd.f32 1.0, %v815_v23 }
 0x23c   : > { %v817_v0 = vpop.eup %816 }
 0x23d   : > { %818 = vrcp.f32 %v516_v63  ;;  %v517_v1 = vadd.f32 1.0, %v817_v0 }
 0x23f   : > { %820 = vrcp.f32 %v517_v1 }
 0x24a   : > { %v819_v2 = vpop.eup %818 }
 0x24b   : > { %v522_v3 = vmul.f32 %v819_v2, %v503_v60 }
 0x24c   : > { %v821_v4 = vpop.eup %820 }
 0x24d   : > { %524 = vst [vmem:[%s230_s18] sm:$0xff] %v522_v3  ;;  %v523_v5 = vmul.f32 %v821_v4, %v505_v62 }
 0x24f   : > { %525 = vst [vmem:[%s230_s18 + $0x8] sm:$0xff] %v523_v5 }
 0x250   : > { %915 = shalt.err (!%p912_p4)
}
 0x251   : > { %s916_s8 = scalar_lea.hbm %s541_s29, 256  ;;  %s920_s19 = scalar_lea.hbm %s1250_s3, 512 }
 0x252   : > { %p917_p6 = scmp.ne.s32.totalorder %s541_s29, %s916_s8  ;;  %p921_p3 = scmp.lt.s32.totalorder %s541_s29, %s1250_s3 }
 0x253   : > { %p922_p5 = scmp.lt.s32.totalorder %s920_s19, %s916_s8 }
 0x254   : > { %p918_p8 = pnand %p917_p6, %p1123_p12 }
 0x255   : > { %p923_p11 = por %p922_p5, %p921_p3 }
 0x256   : > { %p919_p9 = pneg %p918_p8 }
 0x258   : > { %p924_p7 = pnand %p923_p11, %p919_p9 }
 0x25a   : > { %927 = shalt.err (!%p924_p7)
}
 0x25b   : > { %680 = dma.vmem_to_hbm [thread:$0]  (%p1123_p12), %s544_s20, 256, %s541_s29, %s527_s30  }
 0x25c PF: > { %s555_s25 = sand.u32 1, %s970_s12   ;;  %p1267_p10 = scmp.ne.s32.totalorder %s1255_s21, 0 }
 0x25d   : > { %p1268_p13 = scmp.ge.s32.totalorder %s990_s17, 2  ;;  %s556_s26 = scalar_lea.sflag [#allocation5], %s555_s25 }
 0x25f   : > { %p694_p0 = pnand %p1268_p13, %p1267_p10 }
 0x261   : > { %p695_p1 = pneg %p694_p0 }
 0x263   : > { %965 = dma.done.wait (%p695_p1), %s556_s26, 256  }
 0x264   : > { %967 = vsyncadd (%p695_p1), %s556_s26, 4294967040  ;;  %s18_s17 = sadd.s32 1, %s990_s17   ;;  %s1269_s12 = smov %s974_s13 }
 0x265   : > { %p15_p2 = scmp.ge.s32.totalorder %s18_s17, 4   ;;  %s1270_s13 = smov %s978_s14 }
 0x266   : > { %s1271_s14 = smov %s1133_s24  ;;  %s1272_s15 = smov %s986_s16 }
 0x267   : > { %s1273_s16 = smov %s1275_s7  ;;  %17 = sbr.rel (!%p15_p2) target bundleno = 6 (0x6), region = 86 }
 0x26c   :  { %561 = vsyncpa [#allocation4], 1 }
 0x26d   :  { %563 = vsyncpa [#allocation4 + $0x1], 1 }
 0x26e   :  { %564 = vsyncpa [#allocation7], 1 }
 0x26f   :  { %565 = vsyncpa [#allocation5], 1 }
 0x270   :  { %567 = vsyncpa [#allocation5 + $0x1], 1 }

</bundles_post_ra>
